<compile_context>
chip_gen: v7x
topology: tpu7x:2x2x1
jax: 0.10.0
libtpu: 0.0.40
codegen_flags: <defaults>
</compile_context>

<pallas_src>
import jax
import jax.numpy as jnp
from jax.experimental import pallas as pl
from jax.experimental.pallas import tpu as pltpu

_LANE_CAP = 8192                        # widest lane slab considered
_MIN_PIPELINE_BYTES = 1 * 1024 * 1024   # below this a single block is fine
_MIN_STEPS = 4                          # target grid steps for pipelining / megacore


def _scale_kernel(scale_ref, x_ref, o_ref):
    # scale_ref: SMEM (1,) f32 parameter.
    # x_ref / o_ref: VMEM tiles of the flattened input.
    # Compute in f32 (no early cast of the scale to low-precision/int dtypes),
    # cast the product at the store only.
    s = scale_ref[0]
    o_ref[...] = (x_ref[...].astype(jnp.float32) * s).astype(o_ref.dtype)


def _vmem_budget():
    """Return (target_tile_bytes, vmem_limit_bytes) for the current TPU gen."""
    try:
        cap = pltpu.get_tpu_info().vmem_capacity_bytes
    except Exception:
        cap = 64 * 1024 * 1024           # conservative: assume v7x per-TC VMEM
    if cap >= 96 * 1024 * 1024:          # v5e / v6e: 128 MiB physical VMEM
        return 8 * 1024 * 1024, 64 * 1024 * 1024
    # v7x: 64 MiB VMEM per TensorCore -> smaller tiles, tighter scoped limit
    return 4 * 1024 * 1024, 40 * 1024 * 1024


def _scale_pallas_flat(flat: jax.Array, scale: jax.Array) -> jax.Array:
    """Fast path: `flat` is 1-D with size a positive multiple of 128."""
    total = flat.shape[0]
    dtype = flat.dtype
    itemsize = jnp.dtype(dtype).itemsize
    total_bytes = total * itemsize

    # Lane-dense 2-D view: widest lane width (multiple of 128) dividing total.
    lane = 128
    while lane * 2 <= _LANE_CAP and total % (lane * 2) == 0:
        lane *= 2
    rows = total // lane

    target_tile_bytes, vmem_limit = _vmem_budget()

    if rows <= 32:
        # Small input: one full-extent block (always a legal block shape).
        tile_rows = rows
    else:
        # Tile rows are a multiple of 32 (safe sublane packing for
        # f32/bf16/int8/fp8), sized to ~target_tile_bytes per buffer.
        tile_rows = max(32, (target_tile_bytes // (lane * itemsize)) // 32 * 32)
        if total_bytes >= _MIN_PIPELINE_BYTES:
            # Keep >= _MIN_STEPS grid steps so reads/writes overlap across
            # steps and v7x megacore can shard the parallel axis over both TCs.
            cap = (rows // _MIN_STEPS) // 32 * 32
            if cap >= 32:
                tile_rows = min(tile_rows, cap)
        tile_rows = min(tile_rows, (rows // 32) * 32)

    grid = (pl.cdiv(rows, tile_rows),)

    out = pl.pallas_call(
        _scale_kernel,
        out_shape=jax.ShapeDtypeStruct((rows, lane), dtype),
        grid_spec=pltpu.PrefetchScalarGridSpec(
            num_scalar_prefetch=0,
            grid=grid,
            in_specs=[
                pl.BlockSpec(memory_space=pltpu.SMEM),              # scale param
                pl.BlockSpec((tile_rows, lane), lambda i: (i, 0)),  # x tile
                # TODO(synk): bump x's spec to pipeline_mode=pl.Buffered(3) on
                # v7x if profiling still shows exposed DMA gaps at these tiles.
            ],
            out_specs=pl.BlockSpec((tile_rows, lane), lambda i: (i, 0)),
        ),
        compiler_params=pltpu.CompilerParams(
            dimension_semantics=("parallel",),   # megacore-shardable on v7x
            vmem_limit_bytes=vmem_limit,
        ),
        # Reuse x's buffer when the caller donates it; otherwise XLA inserts a
        # defensive copy (correctness-neutral either way).
        input_output_aliases={1: 0},
    )(scale, flat.reshape(rows, lane))

    return out.reshape(total)


def scale_forward(x: jax.Array, scale: jax.Array) -> jax.Array:
    """Elementwise multiply of x (any shape) by a 1-element scale parameter."""
    orig_shape = x.shape
    total = x.size
    if total == 0:
        return x

    rem = total % 128
    if rem == 0:
        # Common NCHW case: no padding copy, no stitch copy.
        return _scale_pallas_flat(x.reshape(-1), scale).reshape(orig_shape)

    # Ragged size: kernel on the 128-aligned prefix, trivial XLA multiply on
    # the <128-element tail (avoids pad+slice of the whole array in HBM).
    flat = x.reshape(-1)
    main = total - rem
    tail = (flat[main:].astype(jnp.float32) * scale[0]).astype(x.dtype)
    if main == 0:
        return tail.reshape(orig_shape)
    head = _scale_pallas_flat(flat[:main], scale)
    return jnp.concatenate([head, tail]).reshape(orig_shape)


if __name__ == "__main__":
    key = jax.random.PRNGKey(0)

    # Deterministic parameter, matching nn.Parameter(torch.FloatTensor([init_value]))
    init_value = 1.5
    scale_param = jnp.array([init_value], dtype=jnp.float32)

    # Small NCHW input consistent with how Scale is used in CenterNet heads.
    x = jax.random.normal(key, (2, 4, 16, 16), dtype=jnp.float32)

    out = scale_forward(x, scale_param)
    out = jax.block_until_ready(out)

    ref = x * scale_param[0]
    assert out.shape == x.shape
    assert out.dtype == x.dtype
    assert jnp.allclose(out, ref, atol=1e-6), "mismatch vs reference"

    # Also exercise a ragged-size input (total % 128 != 0) through the
    # kernel-prefix + XLA-tail path.
    x2 = jax.random.normal(jax.random.PRNGKey(1), (3, 5, 7, 9), dtype=jnp.float32)
    out2 = jax.block_until_ready(scale_forward(x2, scale_param))
    assert jnp.allclose(out2, x2 * scale_param[0], atol=1e-6), "ragged mismatch"

    print("KERNEL_OK")
</pallas_src>

<mosaic_0001>
module attributes {stable_mosaic.version = 11 : i64} {
  func.func @_scale_kernel(%arg0: i32, %arg1: memref<1xf32, #tpu.memory_space<smem>>, %arg2: memref<1x2048xf32, #tpu.memory_space<vmem>>, %arg3: memref<1x2048xf32, #tpu.memory_space<vmem>>) attributes {dimension_semantics = [#tpu.dimension_semantics<parallel>], iteration_bounds = array<i64: 1>, scalar_prefetch = 0 : i64, scratch_operands = 0 : i64, tpu.core_type = #tpu.core_type<tc>, window_params = [{transform_indices = @transform_0, window_bounds = array<i64: 1>}, {transform_indices = @transform_1, window_bounds = array<i64: 1, 2048>}, {transform_indices = @transform_2, window_bounds = array<i64: 1, 2048>}]} {
    %c0 = arith.constant 0 : index
    %0 = memref.load %arg1[%c0] : memref<1xf32, #tpu.memory_space<smem>>
    %c0_0 = arith.constant 0 : index
    %c0_1 = arith.constant 0 : index
    %1 = vector.load %arg2[%c0_0, %c0_1] : memref<1x2048xf32, #tpu.memory_space<vmem>>, vector<1x2048xf32>
    %2 = vector.broadcast %0 : f32 to vector<1x2048xf32>
    %3 = arith.mulf %1, %2 : vector<1x2048xf32>
    %c0_2 = arith.constant 0 : index
    %c0_3 = arith.constant 0 : index
    %4 = vector.load %arg3[%c0_2, %c0_3] : memref<1x2048xf32, #tpu.memory_space<vmem>>, vector<1x2048xf32>
    tpu.vector_store %arg3[%c0_2, %c0_3], %3 {strides = array<i32>} : memref<1x2048xf32, #tpu.memory_space<vmem>>, vector<1x2048xf32>,
    return
  }
  func.func @transform_0(%arg0: i32) -> i32 {
    %c0_i32 = arith.constant 0 : i32
    %c0_i32_0 = arith.constant 0 : i32
    return %c0_i32 : i32
  }
  func.func @transform_1(%arg0: i32) -> (i32, i32) {
    %c0_i32 = arith.constant 0 : i32
    %c0_i32_0 = arith.constant 0 : i32
    return %arg0, %c0_i32 : i32, i32
  }
  func.func @transform_2(%arg0: i32) -> (i32, i32) {
    %c0_i32 = arith.constant 0 : i32
    %c0_i32_0 = arith.constant 0 : i32
    return %arg0, %c0_i32 : i32, i32
  }
}

</mosaic_0001>

<bundles_post_ra>
// kernel: tpu_custom_call.1
= control target key start
LH: loop header
LB: loop body
LE: loop exit
PB: predicated region body
PF: predicated region fallthrough
CT: control target
= control target key end

     0   :  { %8 = vsyncpa [#allocation4], 0  ;;  %s142_s0 = inlined_call_operand.<no memory space> [shape: f32[1], index: 0, kind: input, shape index: {}]   ;;  %s143_s1 = inlined_call_operand.hbm [shape: f32[1,2048], index: 1, kind: input, shape index: {}, may-alias: {1,2}]   ;;  %s144_s2 = inlined_call_operand.hbm [shape: f32[1,2048], index: 2, kind: output, shape index: {}, may-alias: {1,2}]  }
   0x1   :  { %9 = vsyncpa [#allocation5], 0  ;;  %s98_s9 = smov [#allocation3]   ;;  %s50_s13 = scalar_lea.hbm %s143_s1, 256 }
   0x2   :  { %s18_s10 = sshll.u32 %s98_s9, 4  ;;  %p51_p0 = scmp.ne.s32.totalorder %s143_s1, %s50_s13  ;;  %s19_s10 = int_to_ptr.vmem [resolvable:$true] %s18_s10 }
   0x3   :  { %p54_p1 = scmp.lt.u32.totalorder %s50_s13, %s143_s1 }
   0x5   :  { %p56_p2 = pnand %p54_p1, %p51_p0 }
   0x7   :  { %59 = shalt.err (!%p56_p2)
}
   0x8   :  { %s60_s18 = scalar_lea.vmem %s19_s10, 256  ;;  %p65_p4 = scmp.lt.s32.totalorder %s19_s10, %s19_s10 }
   0x9   :  { %p61_p3 = scmp.ne.s32.totalorder %s19_s10, %s60_s18  ;;  %p66_p5 = scmp.lt.s32.totalorder %s60_s18, %s60_s18 }
   0xb   :  { %p67_p6 = por %p66_p5, %p65_p4 }
   0xd   :  { %p68_p7 = pnand %p67_p6, %p61_p3 }
   0xf   :  { %71 = shalt.err (!%p68_p7)
}
  0x10   :  { %21 = dma.hbm_to_vmem [thread:$0]  %s143_s1, 256, %s19_s10, [#allocation4]  }
  0x11   :  { %94 = dma.done.wait [#allocation4], 256  }
  0x12   :  { %95 = vsyncadd [#allocation4], 4294967040  ;;  %v28_v0 = vstv %s142_s0  ;;  %s99_s23 = smov [#allocation6]   ;;  %v26_v1 = vld [vmem:[#allocation3] sm:$0xff]  ;;  %v27_v2 = vld [vmem:[#allocation3 + $0x8] sm:$0xff] }
  0x13   :  { %s39_s24 = sshll.u32 %s99_s23, 4  ;;  %v29_v3 = vmul.f32 %v28_v0, %v26_v1  ;;  %v30_v4 = vmul.f32 %v28_v0, %v27_v2  ;;  %s40_s24 = int_to_ptr.vmem [resolvable:$true] %s39_s24 }
  0x14   :  { %s72_s25 = scalar_lea.vmem %s40_s24, 256  ;;  %p77_p9 = scmp.lt.s32.totalorder %s40_s24, %s40_s24 }
  0x15   :  { %31 = vst [vmem:[#allocation6] sm:$0xff] %v29_v3  ;;  %32 = vst [vmem:[#allocation6 + $0x8] sm:$0xff] %v30_v4  ;;  %p73_p8 = scmp.ne.s32.totalorder %s40_s24, %s72_s25  ;;  %p78_p10 = scmp.lt.s32.totalorder %s72_s25, %s72_s25 }
  0x17   :  { %p79_p11 = por %p78_p10, %p77_p9 }
  0x19   :  { %p80_p12 = pnand %p79_p11, %p73_p8 }
  0x1b   :  { %83 = shalt.err (!%p80_p12)
}
  0x1c   :  { %s84_s0 = scalar_lea.hbm %s144_s2, 256 }
  0x1d   :  { %p85_p13 = scmp.ne.s32.totalorder %s144_s2, %s84_s0  ;;  %p88_p0 = scmp.lt.u32.totalorder %s84_s0, %s144_s2 }
  0x1f   :  { %p90_p1 = pnand %p88_p0, %p85_p13 }
  0x21   :  { %93 = shalt.err (!%p90_p1)
}
  0x22   :  { %42 = dma.vmem_to_hbm [thread:$0]  %s40_s24, 256, %s144_s2, [#allocation5]  }
  0x23   :  { %96 = dma.done.wait [#allocation5], 256  }
  0x24   :  { %97 = vsyncadd [#allocation5], 4294967040 }
  0x25   :  { %46 = vsyncpa [#allocation4], 1 }
  0x26   :  { %47 = vsyncpa [#allocation5], 1 }

</bundles_post_ra>
